<compile_context>
chip_gen: v6e
topology: v6e:2x2x1
jax: 0.10.0
libtpu: 0.0.40
codegen_flags: <defaults>
</compile_context>

<pallas_src>
import functools
import math

import jax
import jax.numpy as jnp
from jax.experimental import pallas as pl
from jax.experimental.pallas import tpu as pltpu

_MASK_VALUE = -1e30  # large finite negative: avoids -inf - -inf NaN paths


def _flash_attn_kernel(q_ref, k_ref, v_ref, wo_ref, bo_ref, o_ref,
                       m_scr, l_scr, acc_scr, *, tq, tk, group):
    qi = pl.program_id(1)          # query-tile index
    hg = pl.program_id(2)          # head-group index
    ki = pl.program_id(3)          # kv-tile index
    nk = pl.num_programs(3)

    # Initialize the resident f32 output block with the out_proj bias, once per
    # (batch, q-tile).  The output block stays resident across the hg/ki axes.
    @pl.when((hg == 0) & (ki == 0))
    def _():
        o_ref[0] = jnp.broadcast_to(bo_ref[...].astype(jnp.float32), o_ref.shape[1:])

    # Reset online-softmax state once per (q-tile, head-group).
    @pl.when(ki == 0)
    def _():
        m_scr[...] = jnp.full_like(m_scr, -jnp.inf)
        l_scr[...] = jnp.zeros_like(l_scr)
        acc_scr[...] = jnp.zeros_like(acc_scr)

    # Causal tile skip.  The K/V index_map clamps the block index to min(ki, qi),
    # so these skipped steps also issue no DMA (tq == tk).
    @pl.when(ki <= qi)
    def _():
        q = q_ref[0]                                                   # (G, tq, hd) bf16
        k = k_ref[0]                                                   # (G, tk, hd) bf16
        v = v_ref[0]                                                   # (G, tk, hd) bf16

        # Scores (scale already folded into W_query): batched over the head group.
        s = jnp.einsum("gqd,gkd->gqk", q, k,
                       preferred_element_type=jnp.float32)             # (G, tq, tk) f32

        # Causal mask with global indices (only diagonal tiles have masked entries).
        row = qi * tq + jax.lax.broadcasted_iota(jnp.int32, s.shape, 1)
        col = ki * tk + jax.lax.broadcasted_iota(jnp.int32, s.shape, 2)
        s = jnp.where(col <= row, s, _MASK_VALUE)

        # Online softmax update (f32 on the VPU / EUP).
        m_prev = m_scr[...]
        m_new = jnp.maximum(m_prev, jnp.max(s, axis=-1, keepdims=True))
        alpha = jnp.exp(m_prev - m_new)
        p = jnp.exp(s - m_new)
        l_scr[...] = alpha * l_scr[...] + jnp.sum(p, axis=-1, keepdims=True)
        acc_scr[...] = alpha * acc_scr[...] + jnp.einsum(
            "gqk,gkd->gqd", p.astype(v.dtype), v,
            preferred_element_type=jnp.float32)
        m_scr[...] = m_new

    # Finalize this head-group: normalize and fold its share of the output
    # projection directly into the resident f32 output block (no head concat).
    @pl.when(ki == nk - 1)
    def _():
        inv_l = pl.reciprocal(l_scr[...], approx=True)
        ctx = (acc_scr[...] * inv_l).astype(jnp.bfloat16)              # (G, tq, hd)
        contrib = jnp.zeros(o_ref.shape[1:], jnp.float32)              # (tq, d_out)
        for g in range(group):                                         # static unroll
            contrib += jnp.dot(ctx[g], wo_ref[g],
                               preferred_element_type=jnp.float32)
        o_ref[0] = o_ref[0] + contrib


def _pick_head_group(num_heads, head_dim, requested=None):
    """Largest divisor of num_heads with group*head_dim <= 512 (capped at 16)."""
    if requested is not None:
        assert num_heads % requested == 0
        return requested
    g = 1
    for cand in range(1, num_heads + 1):
        if num_heads % cand == 0 and cand * head_dim <= 512 and cand <= 16:
            g = cand
    return g


def multi_head_attention(x, wq, wk, wv, wo, bo, *, num_heads,
                         block_size=None, head_group=None):
    """x: (B, T, d_in); wq/wk/wv: (d_in, d_out); wo: (d_out, d_out); bo: (1, d_out)."""
    B, T, d_in = x.shape
    d_out = wq.shape[1]
    assert d_out % num_heads == 0, "d_out must be divisible by num_heads"
    head_dim = d_out // num_heads

    # Large tiles (equal q/kv tiles keep the causal clamp + mask simple).
    tq = block_size if block_size is not None else min(T, 512)
    tk = tq
    assert T % tq == 0, "sequence length must be a multiple of the tile size"

    G = _pick_head_group(num_heads, head_dim, head_group)
    n_hg = num_heads // G

    # Hoisted Q/K/V projections: head-major (B, H, T, hd), bf16 operands, f32 accum.
    # The 1/sqrt(head_dim) scale is folded into W_query here (one-time transform).
    scale = 1.0 / math.sqrt(head_dim)
    xb = x.astype(jnp.bfloat16)
    wq_h = (wq * scale).reshape(d_in, num_heads, head_dim).astype(jnp.bfloat16)
    wk_h = wk.reshape(d_in, num_heads, head_dim).astype(jnp.bfloat16)
    wv_h = wv.reshape(d_in, num_heads, head_dim).astype(jnp.bfloat16)

    def _proj(w):
        return jnp.einsum("btd,dhk->bhtk", xb, w,
                          preferred_element_type=jnp.float32).astype(jnp.bfloat16)

    q = _proj(wq_h)
    k = _proj(wk_h)
    v = _proj(wv_h)

    # Head-major output-projection weight: one head-group slice per grid step.
    wo_r = wo.reshape(num_heads, head_dim, d_out).astype(jnp.bfloat16)
    bo_f = bo.astype(jnp.float32).reshape(1, d_out)

    grid = (B, T // tq, n_hg, T // tk)
    kernel = functools.partial(_flash_attn_kernel, tq=tq, tk=tk, group=G)

    out_f32 = pl.pallas_call(
        kernel,
        out_shape=jax.ShapeDtypeStruct((B, T, d_out), jnp.float32),
        grid_spec=pltpu.PrefetchScalarGridSpec(
            num_scalar_prefetch=0,
            grid=grid,
            in_specs=[
                # Q tile (resident across the kv sweep).
                pl.BlockSpec((1, G, tq, head_dim),
                             lambda b, qi, hg, ki: (b, hg, qi, 0)),
                # K / V tiles; clamp above-diagonal kv blocks -> no DMA on skipped steps.
                pl.BlockSpec((1, G, tk, head_dim),
                             lambda b, qi, hg, ki: (b, hg, jnp.minimum(ki, qi), 0)),
                pl.BlockSpec((1, G, tk, head_dim),
                             lambda b, qi, hg, ki: (b, hg, jnp.minimum(ki, qi), 0)),
                # out_proj weight slice for this head group.
                pl.BlockSpec((G, head_dim, d_out),
                             lambda b, qi, hg, ki: (hg, 0, 0)),
                # out_proj bias.
                pl.BlockSpec((1, d_out), lambda b, qi, hg, ki: (0, 0)),
            ],
            out_specs=pl.BlockSpec((1, tq, d_out), lambda b, qi, hg, ki: (b, qi, 0)),
            scratch_shapes=[
                pltpu.VMEM((G, tq, 1), jnp.float32),         # running max m
                pltpu.VMEM((G, tq, 1), jnp.float32),         # running denom l
                pltpu.VMEM((G, tq, head_dim), jnp.float32),  # context accumulator
            ],
        ),
        compiler_params=pltpu.CompilerParams(
            dimension_semantics=("parallel", "parallel", "arbitrary", "arbitrary"),
            vmem_limit_bytes=48 * 1024 * 1024,  # safe on v7x's 64 MiB VMEM/TC
        ),
    )(q, k, v, wo_r, bo_f)

    return out_f32.astype(x.dtype)


def _reference(x, wq, wk, wv, wo, bo, num_heads):
    """Pure-JAX f32 reference mirroring the PyTorch forward (eval mode)."""
    B, T, d_in = x.shape
    d_out = wq.shape[1]
    hd = d_out // num_heads
    q = (x @ wq).reshape(B, T, num_heads, hd).transpose(0, 2, 1, 3)
    k = (x @ wk).reshape(B, T, num_heads, hd).transpose(0, 2, 1, 3)
    v = (x @ wv).reshape(B, T, num_heads, hd).transpose(0, 2, 1, 3)
    s = jnp.einsum("bhqd,bhkd->bhqk", q, k)
    mask = jnp.triu(jnp.ones((T, T), bool), k=1)
    s = jnp.where(mask, -jnp.inf, s)
    w = jax.nn.softmax(s / math.sqrt(hd), axis=-1)
    ctx = jnp.einsum("bhqk,bhkd->bhqd", w, v).transpose(0, 2, 1, 3).reshape(B, T, d_out)
    return ctx @ wo + bo


def _run_and_check(B, T, d_in, d_out, num_heads, seed=0, tol=2.5e-2,
                   block_size=None, head_group=None):
    key = jax.random.PRNGKey(seed)
    kx, kq, kk, kv, kw, kb = jax.random.split(key, 6)
    x = jax.random.normal(kx, (B, T, d_in), dtype=jnp.float32)

    def lin_init(k, fan_in, fan_out):
        bound = 1.0 / math.sqrt(fan_in)
        return jax.random.uniform(k, (fan_in, fan_out), jnp.float32, -bound, bound)

    wq = lin_init(kq, d_in, d_out)     # W_query (qkv_bias=False)
    wk = lin_init(kk, d_in, d_out)     # W_key
    wv = lin_init(kv, d_in, d_out)     # W_value
    wo = lin_init(kw, d_out, d_out)    # out_proj weight (stored (d_out, d_out), y = x @ W)
    bo = jax.random.uniform(kb, (1, d_out), jnp.float32,
                            -1.0 / math.sqrt(d_out), 1.0 / math.sqrt(d_out))

    out = multi_head_attention(x, wq, wk, wv, wo, bo, num_heads=num_heads,
                               block_size=block_size, head_group=head_group)
    out = jax.block_until_ready(out)

    ref = _reference(x, wq, wk, wv, wo, bo, num_heads)
    assert out.shape == (B, T, d_out)
    err = float(jnp.max(jnp.abs(out - ref)))
    # bf16 MXU operands + approx reciprocal -> looser tolerance than pure f32.
    assert err < tol, f"kernel output mismatch vs reference: max abs err {err}"


if __name__ == "__main__":
    # Small shapes consistent with the module: batch=2, seq=8, d_in=32, d_out=32, 4 heads.
    _run_and_check(B=2, T=8, d_in=32, d_out=32, num_heads=4, seed=0)
    # Longer sequence with explicit small tiles and 2-head groups to exercise the
    # multi-tile flash path, the causal kv-block clamp, and the head-group output
    # accumulation (grid = (2, 4, 2, 4)).
    _run_and_check(B=2, T=256, d_in=64, d_out=64, num_heads=4, seed=0,
                   block_size=64, head_group=2)
    print("KERNEL_OK")
</pallas_src>

<mosaic_0001>
module attributes {stable_mosaic.version = 11 : i64} {
  func.func @_flash_attn_kernel(%arg0: i32, %arg1: i32, %arg2: i32, %arg3: i32, %arg4: memref<1x4x8x8xbf16, #tpu.memory_space<vmem>>, %arg5: memref<1x4x8x8xbf16, #tpu.memory_space<vmem>>, %arg6: memref<1x4x8x8xbf16, #tpu.memory_space<vmem>>, %arg7: memref<4x8x32xbf16, #tpu.memory_space<vmem>>, %arg8: memref<1x32xf32, #tpu.memory_space<vmem>>, %arg9: memref<1x8x32xf32, #tpu.memory_space<vmem>>, %arg10: memref<4x8x1xf32, #tpu.memory_space<vmem>>, %arg11: memref<4x8x1xf32, #tpu.memory_space<vmem>>, %arg12: memref<4x8x8xf32, #tpu.memory_space<vmem>>) attributes {dimension_semantics = [#tpu.dimension_semantics<parallel>, #tpu.dimension_semantics<parallel>, #tpu.dimension_semantics<arbitrary>, #tpu.dimension_semantics<arbitrary>], iteration_bounds = array<i64: 2, 1, 1, 1>, scalar_prefetch = 0 : i64, scratch_operands = 3 : i64, tpu.core_type = #tpu.core_type<tc>, window_params = [{transform_indices = @transform_0, window_bounds = array<i64: 1, 4, 8, 8>}, {transform_indices = @transform_1, window_bounds = array<i64: 1, 4, 8, 8>}, {transform_indices = @transform_2, window_bounds = array<i64: 1, 4, 8, 8>}, {transform_indices = @transform_3, window_bounds = array<i64: 4, 8, 32>}, {pipeline_mode = #tpu.pipeline_mode<synchronous>, transform_indices = @transform_4, window_bounds = array<i64: 1, 32>}, {transform_indices = @transform_5, window_bounds = array<i64: 1, 8, 32>}]} {
    %c0_i32 = arith.constant 0 : i32
    %0 = arith.cmpi eq, %arg2, %c0_i32 : i32
    %c0_i32_0 = arith.constant 0 : i32
    %1 = arith.cmpi eq, %arg3, %c0_i32_0 : i32
    %2 = arith.andi %0, %1 : i1
    %3 = arith.extui %2 : i1 to i32
    %c0_i32_1 = arith.constant 0 : i32
    %4 = arith.cmpi ne, %3, %c0_i32_1 : i32
    scf.if %4 {
      %c0 = arith.constant 0 : index
      %c0_7 = arith.constant 0 : index
      %14 = vector.load %arg8[%c0, %c0_7] : memref<1x32xf32, #tpu.memory_space<vmem>>, vector<1x32xf32>
      %15 = vector.shape_cast %14 : vector<1x32xf32> to vector<1x32xf32>
      %16 = vector.broadcast %15 : vector<1x32xf32> to vector<8x32xf32>
      %c0_8 = arith.constant 0 : index
      %c0_9 = arith.constant 0 : index
      %c0_10 = arith.constant 0 : index
      %17 = vector.load %arg9[%c0_8, %c0_9, %c0_10] : memref<1x8x32xf32, #tpu.memory_space<vmem>>, vector<1x8x32xf32>
      %18 = vector.shape_cast %17 : vector<1x8x32xf32> to vector<8x32xf32>
      %19 = vector.shape_cast %16 : vector<8x32xf32> to vector<1x8x32xf32>
      tpu.vector_store %arg9[%c0_8, %c0_9, %c0_10], %19 {strides = array<i32>} : memref<1x8x32xf32, #tpu.memory_space<vmem>>, vector<1x8x32xf32>,
    } else {
    }
    %c0_i32_2 = arith.constant 0 : i32
    %5 = arith.cmpi eq, %arg3, %c0_i32_2 : i32
    %6 = arith.extui %5 : i1 to i32
    %c0_i32_3 = arith.constant 0 : i32
    %7 = arith.cmpi ne, %6, %c0_i32_3 : i32
    scf.if %7 {
      %cst = arith.constant 0xFF800000 : f32
      %14 = vector.broadcast %cst : f32 to vector<4x8x1xf32>
      %c0 = arith.constant 0 : index
      %c0_7 = arith.constant 0 : index
      %c0_8 = arith.constant 0 : index
      %15 = vector.load %arg10[%c0, %c0_7, %c0_8] : memref<4x8x1xf32, #tpu.memory_space<vmem>>, vector<4x8x1xf32>
      tpu.vector_store %arg10[%c0, %c0_7, %c0_8], %14 {strides = array<i32>} : memref<4x8x1xf32, #tpu.memory_space<vmem>>, vector<4x8x1xf32>,
      %cst_9 = arith.constant 0.000000e+00 : f32
      %16 = vector.broadcast %cst_9 : f32 to vector<4x8x1xf32>
      %c0_10 = arith.constant 0 : index
      %c0_11 = arith.constant 0 : index
      %c0_12 = arith.constant 0 : index
      %17 = vector.load %arg11[%c0_10, %c0_11, %c0_12] : memref<4x8x1xf32, #tpu.memory_space<vmem>>, vector<4x8x1xf32>
      tpu.vector_store %arg11[%c0_10, %c0_11, %c0_12], %16 {strides = array<i32>} : memref<4x8x1xf32, #tpu.memory_space<vmem>>, vector<4x8x1xf32>,
      %cst_13 = arith.constant 0.000000e+00 : f32
      %18 = vector.broadcast %cst_13 : f32 to vector<4x8x8xf32>
      %c0_14 = arith.constant 0 : index
      %c0_15 = arith.constant 0 : index
      %c0_16 = arith.constant 0 : index
      %19 = vector.load %arg12[%c0_14, %c0_15, %c0_16] : memref<4x8x8xf32, #tpu.memory_space<vmem>>, vector<4x8x8xf32>
      tpu.vector_store %arg12[%c0_14, %c0_15, %c0_16], %18 {strides = array<i32>} : memref<4x8x8xf32, #tpu.memory_space<vmem>>, vector<4x8x8xf32>,
    } else {
    }
    %8 = arith.cmpi sle, %arg3, %arg1 : i32
    %9 = arith.extui %8 : i1 to i32
    %c0_i32_4 = arith.constant 0 : i32
    %10 = arith.cmpi ne, %9, %c0_i32_4 : i32
    scf.if %10 {
      %c0 = arith.constant 0 : index
      %c0_7 = arith.constant 0 : index
      %c0_8 = arith.constant 0 : index
      %c0_9 = arith.constant 0 : index
      %14 = vector.load %arg4[%c0, %c0_7, %c0_8, %c0_9] : memref<1x4x8x8xbf16, #tpu.memory_space<vmem>>, vector<1x4x8x8xbf16>
      %15 = vector.shape_cast %14 : vector<1x4x8x8xbf16> to vector<4x8x8xbf16>
      %c0_10 = arith.constant 0 : index
      %c0_11 = arith.constant 0 : index
      %c0_12 = arith.constant 0 : index
      %c0_13 = arith.constant 0 : index
      %16 = vector.load %arg5[%c0_10, %c0_11, %c0_12, %c0_13] : memref<1x4x8x8xbf16, #tpu.memory_space<vmem>>, vector<1x4x8x8xbf16>
      %17 = vector.shape_cast %16 : vector<1x4x8x8xbf16> to vector<4x8x8xbf16>
      %c0_14 = arith.constant 0 : index
      %c0_15 = arith.constant 0 : index
      %c0_16 = arith.constant 0 : index
      %c0_17 = arith.constant 0 : index
      %18 = vector.load %arg6[%c0_14, %c0_15, %c0_16, %c0_17] : memref<1x4x8x8xbf16, #tpu.memory_space<vmem>>, vector<1x4x8x8xbf16>
      %19 = vector.shape_cast %18 : vector<1x4x8x8xbf16> to vector<4x8x8xbf16>
      "tpu.trace_start"() <{level = 10 : i32, message = "gqd,gkd->gqk"}> : () -> ()
      %cst = arith.constant dense<0.000000e+00> : vector<4x8x8xf32>
      %20 = tpu.matmul %15, %17, %cst {dimension_numbers = #tpu.dot_dimension_numbers<[2], [2], [1], [1], [0, 0, 0, 1, 1, 1], [0], [0]>} : vector<4x8x8xbf16>, vector<4x8x8xbf16>, vector<4x8x8xf32> -> vector<4x8x8xf32>
      "tpu.trace_stop"() : () -> ()
      %c8_i32 = arith.constant 8 : i32
      %21 = arith.muli %arg1, %c8_i32 : i32
      %22 = tpu.iota {dimensions = array<i32: 1>} : vector<4x8x8xi32>
      %23 = vector.broadcast %21 : i32 to vector<4x8x8xi32>
      %24 = arith.addi %23, %22 : vector<4x8x8xi32>
      %c8_i32_18 = arith.constant 8 : i32
      %25 = arith.muli %arg3, %c8_i32_18 : i32
      %26 = tpu.iota {dimensions = array<i32: 2>} : vector<4x8x8xi32>
      %27 = vector.broadcast %25 : i32 to vector<4x8x8xi32>
      %28 = arith.addi %27, %26 : vector<4x8x8xi32>
      %29 = arith.cmpi sle, %28, %24 : vector<4x8x8xi32>
      %cst_19 = arith.constant -1.000000e+30 : f32
      %30 = vector.broadcast %cst_19 : f32 to vector<4x8x8xf32>
      %31 = arith.select %29, %20, %30 : vector<4x8x8xi1>, vector<4x8x8xf32>
      %c0_20 = arith.constant 0 : index
      %c0_21 = arith.constant 0 : index
      %c0_22 = arith.constant 0 : index
      %32 = vector.load %arg10[%c0_20, %c0_21, %c0_22] : memref<4x8x1xf32, #tpu.memory_space<vmem>>, vector<4x8x1xf32>
      %cst_23 = arith.constant dense<0xFF800000> : vector<4x8xf32>
      %33 = vector.multi_reduction <maximumf>, %31, %cst_23 [2] : vector<4x8x8xf32> to vector<4x8xf32>
      %34 = vector.shape_cast %33 : vector<4x8xf32> to vector<4x8x1xf32>
      %35 = arith.maximumf %32, %34 : vector<4x8x1xf32>
      %36 = arith.subf %32, %35 : vector<4x8x1xf32>
      %37 = math.exp %36 : vector<4x8x1xf32>
      %38 = vector.broadcast %35 : vector<4x8x1xf32> to vector<4x8x8xf32>
      %39 = arith.subf %31, %38 : vector<4x8x8xf32>
      %40 = math.exp %39 : vector<4x8x8xf32>
      %c0_24 = arith.constant 0 : index
      %c0_25 = arith.constant 0 : index
      %c0_26 = arith.constant 0 : index
      %41 = vector.load %arg11[%c0_24, %c0_25, %c0_26] : memref<4x8x1xf32, #tpu.memory_space<vmem>>, vector<4x8x1xf32>
      %42 = arith.mulf %37, %41 : vector<4x8x1xf32>
      %cst_27 = arith.constant dense<0.000000e+00> : vector<4x8xf32>
      %43 = vector.multi_reduction <add>, %40, %cst_27 [2] : vector<4x8x8xf32> to vector<4x8xf32>
      %44 = vector.shape_cast %43 : vector<4x8xf32> to vector<4x8x1xf32>
      %45 = arith.addf %42, %44 : vector<4x8x1xf32>
      %c0_28 = arith.constant 0 : index
      %c0_29 = arith.constant 0 : index
      %c0_30 = arith.constant 0 : index
      %46 = vector.load %arg11[%c0_28, %c0_29, %c0_30] : memref<4x8x1xf32, #tpu.memory_space<vmem>>, vector<4x8x1xf32>
      tpu.vector_store %arg11[%c0_28, %c0_29, %c0_30], %45 {strides = array<i32>} : memref<4x8x1xf32, #tpu.memory_space<vmem>>, vector<4x8x1xf32>,
      %c0_31 = arith.constant 0 : index
      %c0_32 = arith.constant 0 : index
      %c0_33 = arith.constant 0 : index
      %47 = vector.load %arg12[%c0_31, %c0_32, %c0_33] : memref<4x8x8xf32, #tpu.memory_space<vmem>>, vector<4x8x8xf32>
      %48 = vector.broadcast %37 : vector<4x8x1xf32> to vector<4x8x8xf32>
      %49 = arith.mulf %48, %47 : vector<4x8x8xf32>
      %50 = arith.truncf %40 : vector<4x8x8xf32> to vector<4x8x8xbf16>
      "tpu.trace_start"() <{level = 10 : i32, message = "gqk,gkd->gqd"}> : () -> ()
      %cst_34 = arith.constant dense<0.000000e+00> : vector<4x8x8xf32>
      %51 = tpu.matmul %50, %19, %cst_34 {dimension_numbers = #tpu.dot_dimension_numbers<[2], [1], [1], [2], [0, 0, 0, 1, 1, 2], [0], [0]>} : vector<4x8x8xbf16>, vector<4x8x8xbf16>, vector<4x8x8xf32> -> vector<4x8x8xf32>
      "tpu.trace_stop"() : () -> ()
      %52 = arith.addf %49, %51 : vector<4x8x8xf32>
      %c0_35 = arith.constant 0 : index
      %c0_36 = arith.constant 0 : index
      %c0_37 = arith.constant 0 : index
      %53 = vector.load %arg12[%c0_35, %c0_36, %c0_37] : memref<4x8x8xf32, #tpu.memory_space<vmem>>, vector<4x8x8xf32>
      tpu.vector_store %arg12[%c0_35, %c0_36, %c0_37], %52 {strides = array<i32>} : memref<4x8x8xf32, #tpu.memory_space<vmem>>, vector<4x8x8xf32>,
      %c0_38 = arith.constant 0 : index
      %c0_39 = arith.constant 0 : index
      %c0_40 = arith.constant 0 : index
      %54 = vector.load %arg10[%c0_38, %c0_39, %c0_40] : memref<4x8x1xf32, #tpu.memory_space<vmem>>, vector<4x8x1xf32>
      tpu.vector_store %arg10[%c0_38, %c0_39, %c0_40], %35 {strides = array<i32>} : memref<4x8x1xf32, #tpu.memory_space<vmem>>, vector<4x8x1xf32>,
    } else {
    }
    %c0_i32_5 = arith.constant 0 : i32
    %11 = arith.cmpi eq, %arg3, %c0_i32_5 : i32
    %12 = arith.extui %11 : i1 to i32
    %c0_i32_6 = arith.constant 0 : i32
    %13 = arith.cmpi ne, %12, %c0_i32_6 : i32
    scf.if %13 {
      %c0 = arith.constant 0 : index
      %c0_7 = arith.constant 0 : index
      %c0_8 = arith.constant 0 : index
      %14 = vector.load %arg11[%c0, %c0_7, %c0_8] : memref<4x8x1xf32, #tpu.memory_space<vmem>>, vector<4x8x1xf32>
      %15 = tpu.reciprocal %14 {approx = true} : vector<4x8x1xf32> -> vector<4x8x1xf32>
      %c0_9 = arith.constant 0 : index
      %c0_10 = arith.constant 0 : index
      %c0_11 = arith.constant 0 : index
      %16 = vector.load %arg12[%c0_9, %c0_10, %c0_11] : memref<4x8x8xf32, #tpu.memory_space<vmem>>, vector<4x8x8xf32>
      %17 = vector.broadcast %15 : vector<4x8x1xf32> to vector<4x8x8xf32>
      %18 = arith.mulf %16, %17 : vector<4x8x8xf32>
      %19 = arith.truncf %18 : vector<4x8x8xf32> to vector<4x8x8xbf16>
      %cst = arith.constant 0.000000e+00 : f32
      %20 = vector.broadcast %cst : f32 to vector<8x32xf32>
      %21 = vector.extract_strided_slice %19 {offsets = [0, 0, 0], sizes = [1, 8, 8], strides = [1, 1, 1]} : vector<4x8x8xbf16> to vector<1x8x8xbf16>
      %22 = vector.shape_cast %21 : vector<1x8x8xbf16> to vector<8x8xbf16>
      %c0_12 = arith.constant 0 : index
      %c0_13 = arith.constant 0 : index
      %c0_14 = arith.constant 0 : index
      %23 = vector.load %arg7[%c0_12, %c0_13, %c0_14] : memref<4x8x32xbf16, #tpu.memory_space<vmem>>, vector<1x8x32xbf16>
      %24 = vector.shape_cast %23 : vector<1x8x32xbf16> to vector<8x32xbf16>
      %cst_15 = arith.constant dense<0.000000e+00> : vector<8x32xf32>
      %25 = tpu.matmul %22, %24, %cst_15 {dimension_numbers = #tpu.dot_dimension_numbers<[1], [0], [0], [1], [0, 0, 1, 1], [], []>} : vector<8x8xbf16>, vector<8x32xbf16>, vector<8x32xf32> -> vector<8x32xf32>
      %26 = arith.addf %20, %25 : vector<8x32xf32>
      %27 = vector.extract_strided_slice %19 {offsets = [1, 0, 0], sizes = [1, 8, 8], strides = [1, 1, 1]} : vector<4x8x8xbf16> to vector<1x8x8xbf16>
      %28 = vector.shape_cast %27 : vector<1x8x8xbf16> to vector<8x8xbf16>
      %c1 = arith.constant 1 : index
      %c0_16 = arith.constant 0 : index
      %c0_17 = arith.constant 0 : index
      %29 = vector.load %arg7[%c1, %c0_16, %c0_17] : memref<4x8x32xbf16, #tpu.memory_space<vmem>>, vector<1x8x32xbf16>
      %30 = vector.shape_cast %29 : vector<1x8x32xbf16> to vector<8x32xbf16>
      %cst_18 = arith.constant dense<0.000000e+00> : vector<8x32xf32>
      %31 = tpu.matmul %28, %30, %cst_18 {dimension_numbers = #tpu.dot_dimension_numbers<[1], [0], [0], [1], [0, 0, 1, 1], [], []>} : vector<8x8xbf16>, vector<8x32xbf16>, vector<8x32xf32> -> vector<8x32xf32>
      %32 = arith.addf %26, %31 : vector<8x32xf32>
      %33 = vector.extract_strided_slice %19 {offsets = [2, 0, 0], sizes = [1, 8, 8], strides = [1, 1, 1]} : vector<4x8x8xbf16> to vector<1x8x8xbf16>
      %34 = vector.shape_cast %33 : vector<1x8x8xbf16> to vector<8x8xbf16>
      %c2 = arith.constant 2 : index
      %c0_19 = arith.constant 0 : index
      %c0_20 = arith.constant 0 : index
      %35 = vector.load %arg7[%c2, %c0_19, %c0_20] : memref<4x8x32xbf16, #tpu.memory_space<vmem>>, vector<1x8x32xbf16>
      %36 = vector.shape_cast %35 : vector<1x8x32xbf16> to vector<8x32xbf16>
      %cst_21 = arith.constant dense<0.000000e+00> : vector<8x32xf32>
      %37 = tpu.matmul %34, %36, %cst_21 {dimension_numbers = #tpu.dot_dimension_numbers<[1], [0], [0], [1], [0, 0, 1, 1], [], []>} : vector<8x8xbf16>, vector<8x32xbf16>, vector<8x32xf32> -> vector<8x32xf32>
      %38 = arith.addf %32, %37 : vector<8x32xf32>
      %39 = vector.extract_strided_slice %19 {offsets = [3, 0, 0], sizes = [1, 8, 8], strides = [1, 1, 1]} : vector<4x8x8xbf16> to vector<1x8x8xbf16>
      %40 = vector.shape_cast %39 : vector<1x8x8xbf16> to vector<8x8xbf16>
      %c3 = arith.constant 3 : index
      %c0_22 = arith.constant 0 : index
      %c0_23 = arith.constant 0 : index
      %41 = vector.load %arg7[%c3, %c0_22, %c0_23] : memref<4x8x32xbf16, #tpu.memory_space<vmem>>, vector<1x8x32xbf16>
      %42 = vector.shape_cast %41 : vector<1x8x32xbf16> to vector<8x32xbf16>
      %cst_24 = arith.constant dense<0.000000e+00> : vector<8x32xf32>
      %43 = tpu.matmul %40, %42, %cst_24 {dimension_numbers = #tpu.dot_dimension_numbers<[1], [0], [0], [1], [0, 0, 1, 1], [], []>} : vector<8x8xbf16>, vector<8x32xbf16>, vector<8x32xf32> -> vector<8x32xf32>
      %44 = arith.addf %38, %43 : vector<8x32xf32>
      %c0_25 = arith.constant 0 : index
      %c0_26 = arith.constant 0 : index
      %c0_27 = arith.constant 0 : index
      %45 = vector.load %arg9[%c0_25, %c0_26, %c0_27] : memref<1x8x32xf32, #tpu.memory_space<vmem>>, vector<1x8x32xf32>
      %46 = vector.shape_cast %45 : vector<1x8x32xf32> to vector<8x32xf32>
      %47 = arith.addf %46, %44 : vector<8x32xf32>
      %c0_28 = arith.constant 0 : index
      %c0_29 = arith.constant 0 : index
      %c0_30 = arith.constant 0 : index
      %48 = vector.load %arg9[%c0_28, %c0_29, %c0_30] : memref<1x8x32xf32, #tpu.memory_space<vmem>>, vector<1x8x32xf32>
      %49 = vector.shape_cast %48 : vector<1x8x32xf32> to vector<8x32xf32>
      %50 = vector.shape_cast %47 : vector<8x32xf32> to vector<1x8x32xf32>
      tpu.vector_store %arg9[%c0_28, %c0_29, %c0_30], %50 {strides = array<i32>} : memref<1x8x32xf32, #tpu.memory_space<vmem>>, vector<1x8x32xf32>,
    } else {
    }
    return
  }
  func.func @transform_0(%arg0: i32, %arg1: i32, %arg2: i32, %arg3: i32) -> (i32, i32, i32, i32) {
    %c0_i32 = arith.constant 0 : i32
    %c0_i32_0 = arith.constant 0 : i32
    return %arg0, %arg2, %arg1, %c0_i32 : i32, i32, i32, i32
  }
  func.func @transform_1(%arg0: i32, %arg1: i32, %arg2: i32, %arg3: i32) -> (i32, i32, i32, i32) {
    %0 = arith.minsi %arg3, %arg1 : i32
    %c0_i32 = arith.constant 0 : i32
    %c0_i32_0 = arith.constant 0 : i32
    return %arg0, %arg2, %0, %c0_i32 : i32, i32, i32, i32
  }
  func.func @transform_2(%arg0: i32, %arg1: i32, %arg2: i32, %arg3: i32) -> (i32, i32, i32, i32) {
    %0 = arith.minsi %arg3, %arg1 : i32
    %c0_i32 = arith.constant 0 : i32
    %c0_i32_0 = arith.constant 0 : i32
    return %arg0, %arg2, %0, %c0_i32 : i32, i32, i32, i32
  }
  func.func @transform_3(%arg0: i32, %arg1: i32, %arg2: i32, %arg3: i32) -> (i32, i32, i32) {
    %c0_i32 = arith.constant 0 : i32
    %c0_i32_0 = arith.constant 0 : i32
    %c0_i32_1 = arith.constant 0 : i32
    return %arg2, %c0_i32, %c0_i32_0 : i32, i32, i32
  }
  func.func @transform_4(%arg0: i32, %arg1: i32, %arg2: i32, %arg3: i32) -> (i32, i32) {
    %c0_i32 = arith.constant 0 : i32
    %c0_i32_0 = arith.constant 0 : i32
    %c0_i32_1 = arith.constant 0 : i32
    return %c0_i32, %c0_i32_0 : i32, i32
  }
  func.func @transform_5(%arg0: i32, %arg1: i32, %arg2: i32, %arg3: i32) -> (i32, i32, i32) {
    %c0_i32 = arith.constant 0 : i32
    %c0_i32_0 = arith.constant 0 : i32
    return %arg0, %arg1, %c0_i32 : i32, i32, i32
  }
}

</mosaic_0001>

<bundles_post_ra>
// kernel: tpu_custom_call.1
= control target key start
LH: loop header
LB: loop body
LE: loop exit
PB: predicated region body
PF: predicated region fallthrough
CT: control target
= control target key end

     0   :  { %s2289_s0 = inlined_call_operand.hbm [shape: bf16[2,4,8,8], index: 0, kind: input, shape index: {}]   ;;  %s2290_s1 = inlined_call_operand.hbm [shape: bf16[2,4,8,8], index: 1, kind: input, shape index: {}]   ;;  %s2291_s2 = inlined_call_operand.hbm [shape: bf16[2,4,8,8], index: 2, kind: input, shape index: {}]   ;;  %s2292_s3 = inlined_call_operand.hbm [shape: bf16[4,8,32], index: 3, kind: input, shape index: {}]   ;;  %s2293_s4 = inlined_call_operand.vmem [shape: f32[1,32], index: 4, kind: input, shape index: {}]   ;;  %s2294_s5 = inlined_call_operand.hbm [shape: f32[2,8,32], index: 5, kind: output, shape index: {}]  }
   0x1   :  { %2304 = sst [smem:[#allocation21_spill]] %s2289_s0 }
   0x2   :  { %2305 = sst [smem:[#allocation22_spill]] %s2290_s1 }
   0x3   :  { %10 = vsyncpa [#allocation6], 0 }
   0x4   :  { %12 = vsyncpa [#allocation6 + $0x1], 0 }
   0x5   :  { %13 = vsyncpa [#allocation9], 0 }
   0x6   :  { %15 = vsyncpa [#allocation9 + $0x1], 0 }
   0x7   :  { %16 = vsyncpa [#allocation12], 0 }
   0x8   :  { %17 = vsyncpa [#allocation7], 0 }
   0x9   :  { %19 = vsyncpa [#allocation7 + $0x1], 0  ;;  %s1884_s18 = smov 0   ;;  %s1886_s19 = smov 0  }
   0xa   :  { %s1888_s20 = smov 0   ;;  %s1890_s21 = smov 0  }
   0xb   :  { %s1892_s22 = smov 0   ;;  %s1894_s23 = smov 0  }
   0xc LB: > { %2306 = sst [smem:[#allocation18_spill]] %s1837_s22  ;;  %s51_s24 = sadd.s32 1, %s1837_s22  ;;  %s1841_s23 = sphi %s1894_s23, %s25_s23   ;;  %s1837_s22 = sphi %s1892_s22, %s2327_s22   ;;  %s1833_s21 = sphi %s1890_s21, %s2326_s21   ;;  %s1829_s20 = sphi %s1888_s20, %s2330_s20   ;;  %s1825_s19 = sphi %s1886_s19, %s2329_s19   ;;  %s1821_s18 = sphi %s1884_s18, %s2328_s18  }
   0xd   : > { %s62_s25 = sadd.s32 1, %s1829_s20  ;;  %p53_p0 = scmp.ge.s32.totalorder %s51_s24, 2 }
   0xe   : > { %p69_p1 = scmp.ne.s32.totalorder %s1829_s20, %s1825_s19  ;;  %p70_p2 = scmp.eq.s32.totalorder %s1841_s23, 0 }
   0xf   : > { %s2332_s24 = smov (%p53_p0, %s51_s24), 0  ;;  %p1559_p6 = scmp.lt.s32.totalorder %s1841_s23, 2 }
  0x10   : > { %2307 = sst [smem:[#allocation19_spill]] %s2332_s24  ;;  %p71_p3 = por %p70_p2, %p69_p1 }
  0x11   : > { %s55_s26 = ssub.s32 %s1837_s22, %s2332_s24  ;;  %s2299_s27 = sand.u32 1, %s1829_s20  }
  0x12   : > { %p60_p5 = scmp.eq.s32.totalorder %s55_s26, 0  ;;  %s1930_s28 = sshll.u32 %s1837_s22, 8 }
  0x13   : > { %s1937_s30 = sshll.u32 %s2299_s27, 4  ;;  %p1939_p7 = pnand %p1559_p6, %p71_p3 }
  0x14   : > { %s1933_s29 = scalar_select %p60_p5, %s1829_s20, %s62_s25  }
  0x15   : > { %s285_s7 = sand.u32 1, %s1841_s23   ;;  %s2310_s1 = sld [smem:[#allocation22_spill]] }
  0x16   : > { %2308 = sst [smem:[#allocation20_spill]] %s1933_s29  ;;  %s289_s11 = scalar_lea.vmem [#allocation8], %s1937_s30 }
  0x17   : > { %s301_s12 = sshll.u32 %s289_s11, 4  ;;  %s1949_s13 = scalar_lea.sflag [#allocation9], %s285_s7  ;;  %s302_s12 = int_to_ptr.vmem [resolvable:$true] %s301_s12 }
  0x18   : > { %p2303_p8 = pneg %p1939_p7  ;;  %s1656_s14 = scalar_lea.vmem %s302_s12, 256 }
  0x19   : > { %p1657_p9 = scmp.ne.s32.totalorder %s302_s12, %s1656_s14  ;;  %s1843_s15 = smov [#allocation8]  }
  0x1a   : > { %s1661_s16 = sshll.u32 %s1843_s15, 4  ;;  %s1662_s16 = int_to_ptr.vmem [resolvable:$false] %s1661_s16 }
  0x1b   : > { %s300_s10 = scalar_lea.hbm %s2310_s1, %s1930_s28  ;;  %p1659_p10 = pnand %p1657_p9, %p2303_p8 }
  0x1c   : > { %s1663_s17 = scalar_lea.vmem %s1662_s16, 512  ;;  %p1664_p12 = scmp.lt.s32.totalorder %s302_s12, %s1662_s16 }
  0x1d   : > { %p1660_p11 = pneg %p1659_p10  ;;  %p1665_p13 = scmp.lt.s32.totalorder %s1663_s17, %s1656_s14 }
  0x1f   : > { %p1666_p0 = por %p1665_p13, %p1664_p12 }
  0x21   : > { %p1667_p2 = pnand %p1666_p0, %p1660_p11 }
  0x23   : > { %1670 = shalt.err (!%p1667_p2)
}
  0x24   : > { %s2295_s25 = smov 64   ;;  %s2297_s26 = smov 4  }
  0x25   : > { %1550 = dma.hbm_to_vmem [thread:$0]  (!%p1939_p7), %s300_s10, 256, %s302_s12, %s1949_s13, %s2295_s25, %s2295_s25, %s2297_s26  }
  0x26   : > { %s1963_s7 = sadd.s32 4294967295, %s1841_s23   ;;  %s1393_s8 = sadd.s32 4294967294, %s1841_s23  }
  0x27   : > { %p75_p3 = scmp.ne.s32.totalorder %s1825_s19, %s1821_s18  ;;  %p2302_p5 = scmp.eq.s32.totalorder %s1963_s7, 0 }
  0x28   : > { %p216_p6 = scmp.eq.s32.totalorder %s1963_s7, 1  ;;  %p222_p9 = scmp.eq.s32.totalorder %s1393_s8, 1 }
  0x29   : > { %p1394_p10 = scmp.ge.s32.totalorder %s1841_s23, 1  ;;  %p1973_p11 = por %p2302_p5, %p75_p3 }
  0x2a   : > { %p1980_p12 = por %p216_p6, %p69_p1  ;;  %p1984_p13 = por %p222_p9, %p75_p3 }
  0x2b   : > { %p229_p0 = scmp.lt.s32.totalorder %s1841_s23, 3  ;;  %s1846_s14 = smov [#allocation11]  }
  0x2c   : > { %s2313_s11 = scalar_select %p1984_p13, 1, 0 }
  0x2d   : > { %p1989_p2 = pnand %p1394_p10, %p229_p0  ;;  %s244_s15 = sshll.u32 %s1846_s14, 4  ;;  %s1993_s15 = int_to_ptr.vmem [resolvable:$true] %s244_s15 }
  0x2e   : > { %s2315_s0 = sld [smem:[#allocation21_spill]]  ;;  %s265_s25 = scalar_lea.vmem [#allocation5], %s1937_s30 }
  0x2f   : > { %p1540_p1 = pneg %p1989_p2  ;;  %s275_s26 = sshll.u32 %s265_s25, 4  ;;  %s276_s26 = int_to_ptr.vmem [resolvable:$true] %s275_s26 }
  0x30   : > { %s2317_s1 = sand.u32 1, %s1829_s20   ;;  %s1684_s22 = scalar_lea.vmem %s276_s26, 256 }
  0x31   : > { %p2004_p3 = pnand %p1540_p1, %p2302_p5  ;;  %s262_s24 = scalar_lea.sflag [#allocation6], %s2317_s1 }
  0x32   : > { %p1685_p6 = scmp.ne.s32.totalorder %s276_s26, %s1684_s22  ;;  %s1847_s14 = smov [#allocation5]  }
  0x33   : > { %s1689_s29 = sshll.u32 %s1847_s14, 4  ;;  %s1690_s29 = int_to_ptr.vmem [resolvable:$false] %s1689_s29 }
  0x34   : > { %s274_s8 = scalar_lea.hbm %s2315_s0, %s1930_s28  ;;  %p1687_p9 = pnand %p1685_p6, %p2303_p8 }
  0x35   : > { %s1691_s16 = scalar_lea.vmem %s1690_s29, 512  ;;  %p1692_p0 = scmp.lt.s32.totalorder %s276_s26, %s1690_s29 }
  0x36   : > { %p1688_p10 = pneg %p1687_p9  ;;  %p1693_p4 = scmp.lt.s32.totalorder %s1691_s16, %s1684_s22 }
  0x38   : > { %p1694_p13 = por %p1693_p4, %p1692_p0 }
  0x3a   : > { %p1695_p1 = pnand %p1694_p13, %p1688_p10 }
  0x3c   : > { %1698 = shalt.err (!%p1695_p1)
}
  0x3d   : > { %s2318_s25 = smov 4   ;;  %s2319_s17 = smov 64  }
  0x3e   : > { %1547 = dma.hbm_to_vmem [thread:$0]  (!%p1939_p7), %s274_s8, 256, %s276_s26, %s262_s24, %s2319_s17, %s2319_s17, %s2318_s25  }
  0x3f   : > { %p1701_p6 = pneg %p2004_p3  ;;  %s1710_s1 = scalar_lea.vmem %s1993_s15, 256 }
  0x40   : > { %p1711_p9 = scmp.ne.s32.totalorder %s1993_s15, %s1710_s1  ;;  %p1718_p4 = scmp.lt.s32.totalorder %s1993_s15, %s1993_s15 }
  0x41   : > { %p1719_p13 = scmp.lt.s32.totalorder %s1710_s1, %s1710_s1 }
  0x42   : > { %p1713_p5 = pnand %p1711_p9, %p1701_p6 }
  0x43   : > { %p1720_p10 = por %p1719_p13, %p1718_p4 }
  0x44   : > { %p1714_p8 = pneg %p1713_p5 }
  0x46   : > { %p1721_p0 = pnand %p1720_p10, %p1714_p8 }
  0x48   : > { %1724 = shalt.err (!%p1721_p0)
}
  0x49   : > { %1543 = dma.hbm_to_vmem [thread:$0]  (!%p2004_p3), %s2292_s3, 256, %s1993_s15, [#allocation12], %s2319_s17, %s2319_s17, %s2318_s25  }
  0x4a   : > { %s326_s8 = scalar_lea.hbm %s2291_s2, %s1930_s28  ;;  %s315_s14 = scalar_lea.vmem [#allocation10], %s1937_s30 }
  0x4b   : > { %s327_s16 = sshll.u32 %s315_s14, 4  ;;  %p2320_p5 = pneg %p1939_p7  ;;  %s328_s16 = int_to_ptr.vmem [resolvable:$true] %s327_s16 }
  0x4c   : > { %s1738_s1 = scalar_lea.vmem %s328_s16, 256  ;;  %s1848_s27 = smov [#allocation10]  }
  0x4d   : > { %p1739_p8 = scmp.ne.s32.totalorder %s328_s16, %s1738_s1  ;;  %s1743_s0 = sshll.u32 %s1848_s27, 4  ;;  %s1744_s0 = int_to_ptr.vmem [resolvable:$false] %s1743_s0 }
  0x4e   : > { %s1745_s22 = scalar_lea.vmem %s1744_s0, 512  ;;  %p1746_p9 = scmp.lt.s32.totalorder %s328_s16, %s1744_s0 }
  0x4f   : > { %p1741_p1 = pnand %p1739_p8, %p2320_p5  ;;  %p1747_p4 = scmp.lt.s32.totalorder %s1745_s22, %s1738_s1 }
  0x51   : > { %p1742_p6 = pneg %p1741_p1  ;;  %p1748_p3 = por %p1747_p4, %p1746_p9 }
  0x53   : > { %p1749_p13 = pnand %p1748_p3, %p1742_p6 }
  0x55   : > { %1752 = shalt.err (!%p1749_p13)
}
  0x56   : > { %1553 = dma.hbm_to_vmem [thread:$0]  (!%p1939_p7), %s326_s8, 256, %s328_s16, %s1949_s13, %s2319_s17, %s2319_s17, %s2318_s25  }
  0x57   : > { %339 = sbr.rel (%p1989_p2) target bundleno = 1101 (0x44d), region = 40  ;;  %s2050_s28 = sand.u32 (!%p1989_p2), 1, %s1825_s19  }
  0x58   : > { %s1407_s0 = sshll.u32 (!%p1989_p2), %s2050_s28, 4  ;;  %s342_s30 = scalar_lea.sflag (!%p1989_p2), [#allocation6], %s2050_s28 }
  0x59   : > { %s2054_s15 = scalar_lea.vmem (!%p1989_p2), [#allocation5], %s1407_s0 }
  0x5c   : > { %1804 = dma.done.wait (%p1973_p11), %s342_s30, 256  }
  0x5d   : > { %1806 = vsyncadd (%p1973_p11), %s342_s30, 4294967040  ;;  %s350_s6 = sand.u32 1, %s1963_s7   ;;  %s354_s12 = scalar_lea.vmem [#allocation8], %s1407_s0 }
  0x5e   : > { %s351_s13 = scalar_lea.sflag [#allocation9], %s350_s6 }
  0x5f   : > { %1808 = dma.done.wait (%p1973_p11), %s351_s13, 512  }
  0x60   : > { %1810 = vsyncadd (%p1973_p11), %s351_s13, 4294966784  ;;  %s2065_s25 = scalar_lea.vmem [#allocation10], %s1407_s0  ;;  %p2321_p7 = scmp.eq.s32.totalorder %s1963_s7, 0 }
  0x62   : > { %1812 = dma.done.wait (%p2321_p7), [#allocation12], 256   ;;  %p2322_p2 = pmov %p2321_p7 }
  0x63   : > { %vm440_vm0 = vcmask 64512   ;;  %v1849_v0 = vmov 0.0   ;;  %vm1850_vm1 = vmmov 0   ;;  %v453_v1 = vld [vmem:[%s354_s12] sm:$0xf]  ;;  %vm431_vm2 = vcmask 7168  }
  0x64   : > { %1814 = vsyncadd (%p2322_p2), [#allocation12], 4294967040  ;;  %1456 = vmatprep.subr.bf16.mxu0 %v1849_v0  ;;  %1462 = vmatprep.subr.bf16.mxu1 %v1849_v0  ;;  %441 = vst.msk [vmem:[#allocation4] sm:$0xff] %vm440_vm0, %v1849_v0  ;;  %v454_v2 = vld [vmem:[%s354_s12 + $0x4] sm:$0xf]  ;;  %v466_v3 = vsel %vm440_vm0, %v453_v1, 0  ;;  %v647_v14 = vlaneseq }
  0x65   : > { %442 = vst.msk [vmem:[#allocation4 + $0x8] sm:$0xff] %vm440_vm0, %v1849_v0  ;;  %443 = vst.msk [vmem:[#allocation4 + $0x10] sm:$0xff] %vm440_vm0, %v1849_v0  ;;  %1458 = vmatprep.mubr.msk.bf16.mxu0 %vm1850_vm1, %v1849_v0  ;;  %1464 = vmatprep.mubr.msk.bf16.mxu1 %vm1850_vm1, %v1849_v0  ;;  %v512_v4 = vsel %vm440_vm0, %v454_v2, 0  ;;  %v455_v5 = vld [vmem:[%s354_s12 + $0x8] sm:$0xf]  ;;  %v1851_v13 = vmov -inf  }
  0x66   : > { %444 = vst.msk [vmem:[#allocation4 + $0x18] sm:$0xff] %vm440_vm0, %v1849_v0  ;;  %1457 = vmatpush3.bf16.xpose.msra.mxu0 %v466_v3  ;;  %1463 = vmatpush3.bf16.xpose.msra.mxu1 %v512_v4  ;;  %v456_v6 = vld [vmem:[%s354_s12 + $0xc] sm:$0xf]  ;;  %v449_v7 = vld [vmem:[%s2054_s15] sm:$0xf]  ;;  %v558_v9 = vsel %vm440_vm0, %v455_v5, 0 }
  0x67   : > { %1468 = vmatprep.subr.bf16.mxu0 %v1849_v0  ;;  %1474 = vmatprep.subr.bf16.mxu1 %v1849_v0  ;;  %v450_v8 = vld [vmem:[%s2054_s15 + $0x4] sm:$0xf]  ;;  %v604_v10 = vsel %vm440_vm0, %v456_v6, 0  ;;  %v451_v11 = vld [vmem:[%s2054_s15 + $0x8] sm:$0xf]  ;;  %432 = vst.msk [vmem:[#allocation2] sm:$0xff] %vm431_vm2, %v1851_v13 }
  0x68   : > { %v452_v12 = vld [vmem:[%s2054_s15 + $0xc] sm:$0xf]  ;;  %433 = vst.msk [vmem:[#allocation2 + $0x8] sm:$0xff] %vm431_vm2, %v1851_v13  ;;  %434 = vst.msk [vmem:[#allocation2 + $0x10] sm:$0xff] %vm431_vm2, %v1851_v13  ;;  %v648_v15 = vshrl.u32 %v647_v14, 7  ;;  %v653_v16 = vand.u32 127, %v647_v14 }
  0x69   : > { %435 = vst.msk [vmem:[#allocation2 + $0x18] sm:$0xff] %vm431_vm2, %v1851_v13  ;;  %436 = vst.msk [vmem:[#allocation3] sm:$0xff] %vm431_vm2, %v1849_v0  ;;  %v1852_v41 = vmov 0   ;;  %v457_v57 = vld [vmem:[%s2065_s25] sm:$0xf]  ;;  %vm789_vm4 = vcmask 1043456  }
  0x6a   : > { %437 = vst.msk [vmem:[#allocation3 + $0x8] sm:$0xff] %vm431_vm2, %v1849_v0  ;;  %438 = vst.msk [vmem:[#allocation3 + $0x10] sm:$0xff] %vm431_vm2, %v1849_v0  ;;  %vm656_vm3 = vcmp.le.s32.totalorder %v653_v16, %v648_v15  ;;  %1617 = vset.pattern.permute.xlu0 %v1852_v41  ;;  %1618 = vset.pattern.permute.xlu1 %v1852_v41  ;;  %v791_v59 = vsel %vm789_vm4, %v457_v57, 0  ;;  %v458_v60 = vld [vmem:[%s2065_s25 + $0x4] sm:$0xf]  ;;  %s1411_s7 = sshll.u32 %s2050_s28, 3 }
  0x6b   : > { %439 = vst.msk [vmem:[#allocation3 + $0x18] sm:$0xff] %vm431_vm2, %v1849_v0  ;;  %v837_v61 = vsel %vm789_vm4, %v458_v60, 0  ;;  %v460_v16 = vld [vmem:[%s2065_s25 + $0xc] sm:$0xf]  ;;  %v1028_v57 = vld [vmem:[#allocation11 + $0x4] sm:$0xf] }
  0x6c   : > { %vm426_vm5 = vcmask 261120   ;;  %s403_s24 = scalar_lea.vmem [#allocation13], %s1411_s7  ;;  %s1426_s29 = sshll.u32 %s1833_s21, 7 }
  0x6d   : > { %1459 = vmatmul.mubr.msk.bf16.vlgmr.msra.gmra.mxu0 %vm440_vm0, %v449_v7  ;;  %1465 = vmatmul.mubr.msk.bf16.vlgmr.msra.gmra.mxu1 %vm440_vm0, %v450_v8  ;;  %s1240_s26 = sshll.u32 %s403_s24, 4  ;;  %s2240_s16 = scalar_lea.hbm %s2294_s5, %s1426_s29  ;;  %s2242_s26 = int_to_ptr.vmem [resolvable:$true] %s1240_s26 }
  0x6e   : > { %1469 = vmatpush3.bf16.xpose.msra.mxu0 %v558_v9  ;;  %1475 = vmatpush3.bf16.xpose.msra.mxu1 %v604_v10  ;;  %v2135_v42 = vld [vmem:[#allocation2] sm:$0xff]  ;;  %s1226_s21 = scalar_lea.sflag [#allocation7], %s2050_s28  ;;  %s1753_s1 = scalar_lea.vmem %s2242_s26, 128 }
  0x6f   : > { %1470 = vmatprep.mubr.msk.bf16.mxu0 %vm1850_vm1, %v1849_v0  ;;  %1476 = vmatprep.mubr.msk.bf16.mxu1 %vm1850_vm1, %v1849_v0  ;;  %v2138_v45 = vld [vmem:[#allocation2 + $0x8] sm:$0xff]  ;;  %v2145_v49 = vld [vmem:[#allocation2 + $0x10] sm:$0xff]  ;;  %p1754_p11 = scmp.ne.s32.totalorder %s2242_s26, %s1753_s1  ;;  %s1853_s27 = smov [#allocation13]  }
  0x70   : > { %1480 = vmatprep.subr.bf16.mxu0 %v1849_v0  ;;  %1486 = vmatprep.subr.bf16.mxu1 %v1849_v0  ;;  %v2155_v53 = vld [vmem:[#allocation2 + $0x18] sm:$0xff]  ;;  %s1757_s22 = sshll.u32 %s1853_s27, 4  ;;  %s1758_s22 = int_to_ptr.vmem [resolvable:$false] %s1757_s22 }
  0x71   : > { %p1755_p10 = pnand %p1754_p11, %p1980_p12  ;;  %s1759_s0 = scalar_lea.vmem %s1758_s22, 256 }
  0x72   : > { %p1760_p8 = scmp.lt.s32.totalorder %s2242_s26, %s1758_s22  ;;  %p1761_p5 = scmp.lt.s32.totalorder %s1759_s0, %s1753_s1 }
  0x73   : > { %p1756_p0 = pneg %p1755_p10 }
  0x74   : > { %p1762_p1 = por %p1761_p5, %p1760_p8 }
  0x75   : > { %1471 = vmatmul.mubr.msk.bf16.vlgmr.msra.gmra.mxu0 %vm440_vm0, %v451_v11  ;;  %1477 = vmatmul.mubr.msk.bf16.vlgmr.msra.gmra.mxu1 %vm440_vm0, %v452_v12  ;;  %v459_v11 = vld [vmem:[%s2065_s25 + $0x8] sm:$0xf] }
  0x76   : > { %1482 = vmatprep.mubr.msk.bf16.mxu0 %vm1850_vm1, %v1849_v0  ;;  %1488 = vmatprep.mubr.msk.bf16.mxu1 %vm1850_vm1, %v1849_v0  ;;  %v883_v15 = vsel %vm789_vm4, %v459_v11, 0  ;;  %p1763_p6 = pnand %p1762_p1, %p1756_p0 }
  0x77   : > { %1481 = vmatpush3.bf16.msra.mxu0 %v791_v59  ;;  %1487 = vmatpush3.bf16.msra.mxu1 %v837_v61  ;;  %v1035_v59 = vsel %vm789_vm4, %v1028_v57, 0 }
  0x78   : > { %1492 = vmatprep.subr.bf16.mxu0 %v1849_v0  ;;  %1498 = vmatprep.subr.bf16.mxu1 %v1849_v0 }
 0x12d   : > { %v502_v17 = vpop.f32.mrf.mxu0  ;;  %v548_v18 = vpop.f32.mrf.mxu1 }
 0x12e   : > { %v2122_v19 = vsel %vm656_vm3, %v502_v17, -1e+30  ;;  %v2125_v20 = vsel %vm656_vm3, %v548_v18, -1e+30 }
 0x12f   : > { %v1460_v21 = vpop.f32.mrf.mxu0  ;;  %v1466_v22 = vpop.f32.mrf.mxu1  ;;  %v665_v23 = vsel %vm440_vm0, %v2122_v19, -inf  ;;  %v668_v26 = vsel %vm440_vm0, %v2125_v20, -inf }
 0x130   : > { %666 = vmax.xlane.f32.xlu0 %v665_v23 }
 0x131   : > { %v505_v24 = vpop.f32.mrf.mxu0  ;;  %v551_v25 = vpop.f32.mrf.mxu1 }
 0x133   : > { %v1461_v27 = vpop.f32.mrf.mxu0  ;;  %v1467_v28 = vpop.f32.mrf.mxu1 }
 0x134   : > { %669 = vmax.xlane.f32.xlu0 %v668_v26 }
 0x135   : > { %v594_v29 = vpop.f32.mrf.mxu0  ;;  %v640_v30 = vpop.f32.mrf.mxu1 }
 0x136   : > { %v659_v31 = vsel %vm656_vm3, %v594_v29, -1e+30  ;;  %v660_v32 = vsel %vm656_vm3, %v640_v30, -1e+30 }
 0x137   : > { %v1472_v33 = vpop.f32.mrf.mxu0  ;;  %v1478_v34 = vpop.f32.mrf.mxu1  ;;  %v671_v35 = vsel %vm440_vm0, %v659_v31, -inf  ;;  %v674_v38 = vsel %vm440_vm0, %v660_v32, -inf }
 0x138   : > { %672 = vmax.xlane.f32.xlu1 %v671_v35  ;;  %v725_v35 = vld [vmem:[#allocation3] sm:$0xff] }
 0x139   : > { %v597_v36 = vpop.f32.mrf.mxu0  ;;  %v643_v37 = vpop.f32.mrf.mxu1 }
 0x13b   : > { %v1473_v39 = vpop.f32.mrf.mxu0  ;;  %v1479_v40 = vpop.f32.mrf.mxu1 }
 0x13c   : > { %675 = vmax.xlane.f32.xlu1 %v674_v38  ;;  %v726_v38 = vld [vmem:[#allocation3 + $0x8] sm:$0xff] }
 0x1b9   : > { %v667_v43 = vpop.xlane.xlu0 %666 }
 0x1ba   : > { %v677_v44 = vmax.f32 %v2135_v42, %v667_v43 }
 0x1bc   : > { %v681_v46 = vsub.f32 %v2135_v42, %v677_v44  ;;  %979 = vst.msk [vmem:[#allocation2] sm:$0xff] %vm431_vm2, %v677_v44  ;;  %695 = vperm.xlu0 %1617, %v677_v44   ;;  %v727_v42 = vld [vmem:[#allocation3 + $0x10] sm:$0xff] }
 0x1bd   : > { %v670_v47 = vpop.xlane.xlu0 %669 }
 0x1be   : > { %v2143_v48 = vmax.f32 %v2138_v45, %v670_v47  ;;  %v685_v21 = vmul.f32 1.442695, %v681_v46  ;;  %v728_v46 = vld [vmem:[#allocation3 + $0x18] sm:$0xff] }
 0x1c0   : > { %v682_v50 = vsub.f32 %v2138_v45, %v2143_v48  ;;  %980 = vst.msk [vmem:[#allocation2 + $0x8] sm:$0xff] %vm431_vm2, %v2143_v48  ;;  %700 = vperm.xlu1 %1618, %v2143_v48  }
 0x1c1   : > { %v673_v51 = vpop.xlane.xlu1 %672 }
 0x1c2   : > { %v2153_v52 = vmax.f32 %v2145_v49, %v673_v51  ;;  %v687_v26 = vmul.f32 1.442695, %v682_v50 }
 0x1c4   : > { %v683_v54 = vsub.f32 %v2145_v49, %v2153_v52  ;;  %981 = vst.msk [vmem:[#allocation2 + $0x10] sm:$0xff] %vm431_vm2, %v2153_v52  ;;  %705 = vperm.xlu1 %1618, %v2153_v52  }
 0x1c5   : > { %v676_v55 = vpop.xlane.xlu1 %675 }
 0x1c6   : > { %v2163_v56 = vmax.f32 %v2155_v53, %v676_v55  ;;  %v689_v29 = vmul.f32 1.442695, %v683_v54  ;;  %v1026_v54 = vld [vmem:[#allocation11] sm:$0xf] }
 0x1c7   : > { %v1081_v55 = vsel %vm789_vm4, %v1026_v54, 0 }
 0x1c8   : > { %v684_v58 = vsub.f32 %v2155_v53, %v2163_v56  ;;  %982 = vst.msk [vmem:[#allocation2 + $0x18] sm:$0xff] %vm431_vm2, %v2163_v56  ;;  %710 = vperm.xlu1 %1618, %v2163_v56  }
 0x1ca   : > { %v691_v30 = vmul.f32 1.442695, %v684_v58 }
 0x237   : > { %v696_v62 = vpop.permute.xlu0 %695 }
 0x238   : > { %v713_v63 = vsub.f32 %v2122_v19, %v696_v62 }
 0x23a   : > { %v717_v1 = vmul.f32 1.442695, %v713_v63 }
 0x23b   : > { %v701_v2 = vpop.permute.xlu1 %700 }
 0x23c   : > { %1619 = vpow2.f32 %v717_v1  ;;  %v714_v3 = vsub.f32 %v2125_v20, %v701_v2  ;;  %v929_v20 = vsel %vm789_vm4, %v460_v16, 0  ;;  %v754_v1 = vld [vmem:[#allocation4] sm:$0xff] }
 0x23e   : > { %v719_v4 = vmul.f32 1.442695, %v714_v3 }
 0x23f   : > { %v706_v5 = vpop.permute.xlu1 %705 }
 0x240   : > { %1621 = vpow2.f32 %v719_v4  ;;  %v715_v6 = vsub.f32 %v659_v31, %v706_v5  ;;  %v755_v4 = vld [vmem:[#allocation4 + $0x8] sm:$0xff] }
 0x242   : > { %v721_v7 = vmul.f32 1.442695, %v715_v6 }
 0x243   : > { %v711_v8 = vpop.permute.xlu1 %710 }
 0x244   : > { %1623 = vpow2.f32 %v721_v7  ;;  %v716_v9 = vsub.f32 %v660_v32, %v711_v8 }
 0x246   : > { %v723_v10 = vmul.f32 1.442695, %v716_v9 }
 0x248   : > { %1625 = vpow2.f32 %v723_v10  ;;  %v756_v10 = vld [vmem:[#allocation4 + $0x10] sm:$0xff] }
 0x249   : > { %v1620_v12 = vpop.eup %1619  ;;  %1627 = vpow2.f32 %v685_v21 }
 0x24a   : > { %v733_v13 = vsel %vm440_vm0, %v1620_v12, 0.0  ;;  %v782_v14 = vpack.c.bf16 %v1620_v12, %v1620_v12  ;;  %1629 = vpow2.f32 %v687_v26 }
 0x24b   : > { %734 = vadd.xlane.f32.xlu0 %v733_v13  ;;  %1631 = vpow2.f32 %v689_v29 }
 0x24c   : > { %1483 = vmatmul.mubr.msk.bf16.vlgmr.msra.gmra.mxu0 %vm440_vm0, %v782_v14  ;;  %1633 = vpow2.f32 %v691_v30 }
 0x24d   : > { %v1622_v17 = vpop.eup %1621  ;;  %1493 = vmatpush3.bf16.msra.mxu0 %v883_v15  ;;  %1494 = vmatprep.mubr.msk.bf16.mxu0 %vm1850_vm1, %v1849_v0 }
 0x24e   : > { %v736_v18 = vsel %vm440_vm0, %v1622_v17, 0.0  ;;  %v783_v19 = vpack.c.bf16 %v1622_v17, %v1622_v17  ;;  %1504 = vmatprep.subr.bf16.mxu0 %v1849_v0 }
 0x24f   : > { %737 = vadd.xlane.f32.xlu1 %v736_v18  ;;  %v757_v18 = vld [vmem:[#allocation4 + $0x18] sm:$0xff] }
 0x250   : > { %1489 = vmatmul.mubr.msk.bf16.vlgmr.msra.gmra.mxu1 %vm440_vm0, %v783_v19 }
 0x251   : > { %v1624_v22 = vpop.eup %1623  ;;  %1499 = vmatpush3.bf16.msra.mxu1 %v929_v20  ;;  %1500 = vmatprep.mubr.msk.bf16.mxu1 %vm1850_vm1, %v1849_v0 }
 0x252   : > { %v739_v23 = vsel %vm440_vm0, %v1624_v22, 0.0  ;;  %v784_v24 = vpack.c.bf16 %v1624_v22, %v1624_v22  ;;  %1510 = vmatprep.subr.bf16.mxu1 %v1849_v0 }
 0x253   : > { %740 = vadd.xlane.f32.xlu1 %v739_v23 }
 0x254   : > { %1495 = vmatmul.mubr.msk.bf16.vlgmr.msra.gmra.mxu0 %vm440_vm0, %v784_v24 }
 0x255   : > { %v1626_v25 = vpop.eup %1625  ;;  %1506 = vmatprep.mubr.msk.bf16.mxu0 %vm1850_vm1, %v1849_v0  ;;  %1505 = vmatpush3.bf16.msra.mxu0 %v1035_v59 }
 0x256   : > { %v742_v27 = vsel %vm440_vm0, %v1626_v25, 0.0  ;;  %v785_v28 = vpack.c.bf16 %v1626_v25, %v1626_v25  ;;  %v1628_v31 = vpop.eup %1627  ;;  %1516 = vmatprep.subr.bf16.mxu0 %v1849_v0 }
 0x257   : > { %743 = vadd.xlane.f32.xlu1 %v742_v27  ;;  %v1630_v32 = vpop.eup %1629  ;;  %v729_v36 = vmul.f32 %v1628_v31, %v725_v35 }
 0x258   : > { %1501 = vmatmul.mubr.msk.bf16.vlgmr.msra.gmra.mxu1 %vm440_vm0, %v785_v28  ;;  %v1632_v33 = vpop.eup %1631  ;;  %v730_v40 = vmul.f32 %v1630_v32, %v726_v38 }
 0x259   : > { %1512 = vmatprep.mubr.msk.bf16.mxu1 %vm1850_vm1, %v1849_v0  ;;  %v1634_v34 = vpop.eup %1633  ;;  %v731_v44 = vmul.f32 %v1632_v33, %v727_v42  ;;  %1511 = vmatpush3.bf16.msra.mxu1 %v1081_v55 }
 0x25a   : > { %v732_v49 = vmul.f32 %v1634_v34, %v728_v46  ;;  %1522 = vmatprep.subr.bf16.mxu1 %v1849_v0 }
 0x261   : > { %760 = vperm.xlu0 %1617, %v1628_v31  }
 0x268   : > { %765 = vperm.xlu1 %1618, %v1630_v32  }
 0x26c   : > { %770 = vperm.xlu1 %1618, %v1632_v33  }
 0x270   : > { %775 = vperm.xlu1 %1618, %v1634_v34   ;;  %v1173_v34 = vld [vmem:[#allocation11 + $0xc] sm:$0xf] }
 0x2d4   : > { %v735_v37 = vpop.xlane.xlu0 %734 }
 0x2d5   : > { %v745_v39 = vadd.f32 %v735_v37, %v729_v36  ;;  %v1178_v37 = vsel %vm789_vm4, %v1173_v34, 0 }
 0x2d7   : > { %750 = vst.msk [vmem:[#allocation3] sm:$0xff] %vm431_vm2, %v745_v39 }
 0x2d8   : > { %v738_v41 = vpop.xlane.xlu1 %737 }
 0x2d9   : > { %v746_v43 = vadd.f32 %v738_v41, %v730_v40  ;;  %v1124_v40 = vld [vmem:[#allocation11 + $0x8] sm:$0xf] }
 0x2db   : > { %751 = vst.msk [vmem:[#allocation3 + $0x8] sm:$0xff] %vm431_vm2, %v746_v43  ;;  %v1129_v43 = vsel %vm789_vm4, %v1124_v40, 0 }
 0x2dc   : > { %v741_v45 = vpop.xlane.xlu1 %740  ;;  %v761_v2 = vpop.permute.xlu0 %760 }
 0x2dd   : > { %v747_v47 = vadd.f32 %v741_v45, %v731_v44  ;;  %v778_v3 = vmul.f32 %v761_v2, %v754_v1 }
 0x2de   : > { %v986_v48 = vld [vmem:[#allocation3] sm:$0xff] }
 0x2df   : > { %752 = vst.msk [vmem:[#allocation3 + $0x10] sm:$0xff] %vm431_vm2, %v747_v47  ;;  %1635 = vrcp.f32 %v986_v48 }
 0x2e0   : > { %v744_v50 = vpop.xlane.xlu1 %743 }
 0x2e1   : > { %v748_v51 = vadd.f32 %v744_v50, %v732_v49 }
 0x2e2   : > { %v987_v52 = vld [vmem:[#allocation3 + $0x8] sm:$0xff] }
 0x2e3   : > { %753 = vst.msk [vmem:[#allocation3 + $0x18] sm:$0xff] %vm431_vm2, %v748_v51  ;;  %1637 = vrcp.f32 %v987_v52  ;;  %v1412_v52 = vld [vmem:[%s2293_s4] ss:$0 sm:$0xff] }
 0x2e4   : > { %v766_v63 = vpop.permute.xlu1 %765  ;;  %427 = vst.msk [vmem:[%s403_s24] sm:$0xff] %vm426_vm5, %v1412_v52 }
 0x2e5   : > { %v779_v9 = vmul.f32 %v766_v63, %v755_v4 }
 0x2e6   : > { %v988_v53 = vld [vmem:[#allocation3 + $0x10] sm:$0xff] }
 0x2e7   : > { %1639 = vrcp.f32 %v988_v53 }
 0x2e8   : > { %v771_v6 = vpop.permute.xlu1 %770 }
 0x2e9   : > { %v780_v16 = vmul.f32 %v771_v6, %v756_v10 }
 0x2ea   : > { %v989_v56 = vld [vmem:[#allocation3 + $0x18] sm:$0xff] }
 0x2eb   : > { %1641 = vrcp.f32 %v989_v56  ;;  %v1221_v1 = vld [vmem:[%s403_s24] sm:$0xff] }
 0x2ec   : > { %v1636_v58 = vpop.eup %1635  ;;  %v776_v17 = vpop.permute.xlu1 %775 }
 0x2ed   : > { %1000 = vperm.xlu0 %1617, %v1636_v58   ;;  %v781_v24 = vmul.f32 %v776_v17, %v757_v18 }
 0x2f0   : > { %v1638_v60 = vpop.eup %1637 }
 0x2f1   : > { %1005 = vperm.xlu1 %1618, %v1638_v60  }
 0x2f4   : > { %v1640_v61 = vpop.eup %1639 }
 0x2f5   : > { %1010 = vperm.xlu1 %1618, %v1640_v61  }
 0x2f8   : > { %v1642_v62 = vpop.eup %1641 }
 0x2f9   : > { %1015 = vperm.xlu0 %1617, %v1642_v62  }
 0x30c   : > { %v827_v5 = vpop.f32.mrf.mxu0 }
 0x30d   : > { %v971_v7 = vadd.f32 %v827_v5, %v778_v3 }
 0x30e   : > { %v1484_v8 = vpop.f32.mrf.mxu0 }
 0x30f   : > { %975 = vst.msk [vmem:[#allocation4] sm:$0xff] %vm440_vm0, %v971_v7 }
 0x310   : > { %v830_v11 = vpop.f32.mrf.mxu0  ;;  %v873_v12 = vpop.f32.mrf.mxu1 }
 0x311   : > { %v972_v13 = vadd.f32 %v873_v12, %v779_v9 }
 0x312   : > { %v1485_v14 = vpop.f32.mrf.mxu0  ;;  %v1490_v15 = vpop.f32.mrf.mxu1 }
 0x313   : > { %976 = vst.msk [vmem:[#allocation4 + $0x8] sm:$0xff] %vm440_vm0, %v972_v13 }
 0x314   : > { %v876_v19 = vpop.f32.mrf.mxu1  ;;  %v919_v20 = vpop.f32.mrf.mxu0 }
 0x315   : > { %v973_v21 = vadd.f32 %v919_v20, %v780_v16 }
 0x316   : > { %v1491_v22 = vpop.f32.mrf.mxu1  ;;  %v1496_v23 = vpop.f32.mrf.mxu0  ;;  %v994_v32 = vld [vmem:[#allocation4] sm:$0xff] }
 0x317   : > { %977 = vst.msk [vmem:[#allocation4 + $0x10] sm:$0xff] %vm440_vm0, %v973_v21 }
 0x318   : > { %v922_v25 = vpop.f32.mrf.mxu0  ;;  %v965_v26 = vpop.f32.mrf.mxu1 }
 0x319   : > { %v974_v27 = vadd.f32 %v965_v26, %v781_v24 }
 0x31a   : > { %v1497_v28 = vpop.f32.mrf.mxu0  ;;  %v1502_v29 = vpop.f32.mrf.mxu1  ;;  %v995_v38 = vld [vmem:[#allocation4 + $0x8] sm:$0xff] }
 0x31b   : > { %978 = vst.msk [vmem:[#allocation4 + $0x18] sm:$0xff] %vm440_vm0, %v974_v27 }
 0x31c   : > { %v968_v30 = vpop.f32.mrf.mxu1 }
 0x31e   : > { %v1503_v31 = vpop.f32.mrf.mxu1  ;;  %v996_v45 = vld [vmem:[#allocation4 + $0x10] sm:$0xff] }
 0x322   : > { %v997_v47 = vld [vmem:[#allocation4 + $0x18] sm:$0xff] }
 0x368   : > { %v1001_v33 = vpop.permute.xlu0 %1000 }
 0x369   : > { %v1018_v35 = vmul.f32 %v1001_v33, %v994_v32 }
 0x36b   : > { %v1022_v36 = vpack.c.bf16 %v1018_v35, %v1018_v35 }
 0x36c   : > { %v1006_v39 = vpop.permute.xlu1 %1005 }
 0x36d   : > { %v1019_v41 = vmul.f32 %v1006_v39, %v995_v38  ;;  %1513 = vmatmul.mubr.msk.bf16.vlgmr.msra.gmra.mxu1 %vm440_vm0, %v1022_v36 }
 0x36e   : > { %1523 = vmatpush3.bf16.msra.mxu1 %v1178_v37  ;;  %1524 = vmatprep.mubr.msk.bf16.mxu1 %vm1850_vm1, %v1849_v0 }
 0x36f   : > { %v1023_v42 = vpack.c.bf16 %v1019_v41, %v1019_v41 }
 0x370   : > { %v1011_v44 = vpop.permute.xlu1 %1010 }
 0x371   : > { %1507 = vmatmul.mubr.msk.bf16.vlgmr.msra.gmra.mxu0 %vm440_vm0, %v1023_v42  ;;  %v1020_v46 = vmul.f32 %v1011_v44, %v996_v45 }
 0x372   : > { %1517 = vmatpush3.bf16.msra.mxu0 %v1129_v43  ;;  %1518 = vmatprep.mubr.msk.bf16.mxu0 %vm1850_vm1, %v1849_v0 }
 0x373   : > { %v1024_v50 = vpack.c.bf16 %v1020_v46, %v1020_v46 }
 0x374   : > { %v1016_v48 = vpop.permute.xlu0 %1015 }
 0x375   : > { %v1021_v49 = vmul.f32 %v1016_v48, %v997_v47 }
 0x377   : > { %v1025_v51 = vpack.c.bf16 %v1021_v49, %v1021_v49 }
 0x379   : > { %1519 = vmatmul.mubr.msk.bf16.vlgmr.msra.gmra.mxu0 %vm440_vm0, %v1024_v50  ;;  %1525 = vmatmul.mubr.msk.bf16.vlgmr.msra.gmra.mxu1 %vm440_vm0, %v1025_v51 }
 0x42d   : > { %v1117_v0 = vpop.f32.mrf.mxu1 }
 0x42f   : > { %v1514_v53 = vpop.f32.mrf.mxu1 }
 0x431   : > { %v1071_v54 = vpop.f32.mrf.mxu0  ;;  %v1120_v55 = vpop.f32.mrf.mxu1 }
 0x432   : > { %v1118_v60 = vadd.f32 %v1117_v0, %v1071_v54 }
 0x433   : > { %v1508_v56 = vpop.f32.mrf.mxu0  ;;  %v1515_v57 = vpop.f32.mrf.mxu1 }
 0x435   : > { %v1074_v58 = vpop.f32.mrf.mxu0 }
 0x437   : > { %v1509_v59 = vpop.f32.mrf.mxu0 }
 0x439   : > { %v1165_v61 = vpop.f32.mrf.mxu0  ;;  %v1214_v62 = vpop.f32.mrf.mxu1 }
 0x43a   : > { %v1171_v63 = vadd.f32 %v1165_v61, %v1118_v60 }
 0x43b   : > { %v1520_v2 = vpop.f32.mrf.mxu0  ;;  %v1526_v3 = vpop.f32.mrf.mxu1 }
 0x43c   : > { %v1220_v4 = vadd.f32 %v1214_v62, %v1171_v63 }
 0x43d   : > { %v1168_v5 = vpop.f32.mrf.mxu0  ;;  %v1217_v6 = vpop.f32.mrf.mxu1 }
 0x43e   : > { %v1222_v7 = vadd.f32 %v1221_v1, %v1220_v4 }
 0x43f   : > { %v1521_v8 = vpop.f32.mrf.mxu0  ;;  %v1527_v9 = vpop.f32.mrf.mxu1 }
 0x440   : > { %1224 = vst.msk [vmem:[%s403_s24] sm:$0xff] %vm426_vm5, %v1222_v7 }
 0x441   : > { %1766 = shalt.err (!%p1763_p6)
}
 0x442   : > { %s1767_s30 = scalar_lea.hbm %s2240_s16, 128  ;;  %s1771_s6 = scalar_lea.hbm %s2294_s5, 256 }
 0x443   : > { %p1768_p9 = scmp.ne.s32.totalorder %s2240_s16, %s1767_s30  ;;  %p1772_p13 = scmp.lt.s32.totalorder %s2240_s16, %s2294_s5 }
 0x444   : > { %p1773_p7 = scmp.lt.s32.totalorder %s1771_s6, %s1767_s30 }
 0x445   : > { %p1769_p4 = pnand %p1768_p9, %p1980_p12 }
 0x446   : > { %p1774_p2 = por %p1773_p7, %p1772_p13 }
 0x447   : > { %p1770_p3 = pneg %p1769_p4 }
 0x449   : > { %p1775_p11 = pnand %p1774_p2, %p1770_p3 }
 0x44b   : > { %1778 = shalt.err (!%p1775_p11)
}
 0x44c   : > { %1538 = dma.vmem_to_hbm [thread:$0]  (%p1980_p12), %s2242_s26, 128, %s2240_s16, %s1226_s21  }
 0x44d PF: > { %s1252_s25 = sand.u32 1, %s1821_s18   ;;  %p2323_p10 = scmp.ne.s32.totalorder %s2313_s11, 0 }
 0x44e   : > { %p2324_p0 = scmp.ge.s32.totalorder %s1841_s23, 2  ;;  %s1253_s7 = scalar_lea.sflag [#allocation7], %s1252_s25 }
 0x450   : > { %p1555_p8 = pnand %p2324_p0, %p2323_p10 }
 0x452   : > { %p1556_p5 = pneg %p1555_p8 }
 0x454   : > { %1816 = dma.done.wait (%p1556_p5), %s1253_s7, 128  }
 0x455   : > { %1818 = vsyncadd (%p1556_p5), %s1253_s7, 4294967168  ;;  %s25_s23 = sadd.s32 1, %s1841_s23   ;;  %s2325_s10 = sld [smem:[#allocation20_spill]] }
 0x456   : > { %p22_p1 = scmp.ge.s32.totalorder %s25_s23, 4   ;;  %s2326_s21 = sld [smem:[#allocation18_spill]] }
 0x457   : > { %s2327_s22 = sld [smem:[#allocation19_spill]]  ;;  %s2328_s18 = smov %s1825_s19 }
 0x458   : > { %s2329_s19 = smov %s1829_s20  ;;  %24 = sbr.rel (!%p22_p1) target bundleno = 12 (0xc), region = 133 }
 0x45b   : > { %s2330_s20 = smov %s2325_s10 }
 0x45d   :  { %1258 = vsyncpa [#allocation6], 1 }
 0x45e   :  { %1260 = vsyncpa [#allocation6 + $0x1], 1 }
 0x45f   :  { %1261 = vsyncpa [#allocation9], 1 }
 0x460   :  { %1263 = vsyncpa [#allocation9 + $0x1], 1 }
 0x461   :  { %1264 = vsyncpa [#allocation12], 1 }
 0x462   :  { %1265 = vsyncpa [#allocation7], 1 }
 0x463   :  { %1267 = vsyncpa [#allocation7 + $0x1], 1 }

</bundles_post_ra>
